<compile_context>
chip_gen: v5e
topology: v5e:2x2
jax: 0.10.0
libtpu: 0.0.40
codegen_flags: <defaults>
</compile_context>

<pallas_src>
import functools

import jax
import jax.numpy as jnp
from jax.experimental import pallas as pl
from jax.experimental.pallas import tpu as pltpu

_NEG_BIG = -1e30  # padded-class bias: exp(logit - max) underflows to exactly 0


def _round_up(v, m):
    return (v + m - 1) // m * m


def _cdiv(a, b):
    return -(-a // b)


def _predictor_kernel(x_ref, w1_ref, w23_ref, b_ref, o_ref, *, HP, CP):
    x = x_ref[...]                       # already bf16 (streamed as bf16)

    b1 = b_ref[:, 0:HP]                  # static, lane-aligned slices of the
    b2 = b_ref[:, HP:2 * HP]             # packed bias buffer (free Ref views)
    b3 = b_ref[:, 2 * HP:2 * HP + CP]

    # Linear 1 + ReLU (f32 accumulate / VPU math)
    h1 = jnp.dot(x, w1_ref[...], preferred_element_type=jnp.float32) + b1
    h1 = jnp.maximum(h1, 0.0)

    # Linear 2 + ReLU
    w2 = w23_ref[:, 0:HP]
    h2 = jnp.dot(h1.astype(jnp.bfloat16), w2,
                 preferred_element_type=jnp.float32) + b2
    h2 = jnp.maximum(h2, 0.0)

    # Linear 3
    w3 = w23_ref[:, HP:HP + CP]
    logits = jnp.dot(h2.astype(jnp.bfloat16), w3,
                     preferred_element_type=jnp.float32) + b3

    # Numerically stable softmax over the padded (lane-dense) class axis.
    # Padded class lanes have bias -1e30 -> exp() == 0, so they don't perturb
    # the distribution over the real classes.
    m = jnp.max(logits, axis=1, keepdims=True)
    e = jnp.exp(logits - m)
    s = jnp.sum(e, axis=1, keepdims=True)
    # Exact reciprocal: one extra EUP op in an otherwise-free slot, keeps row
    # sums equal to 1 at f32 precision.
    o_ref[...] = (e * pl.reciprocal(s)).astype(o_ref.dtype)


def pack_params(params):
    """Pad to MXU/lane-friendly shapes, cast weights to bf16, and pack:
       w1 (IP,HP) bf16, [w2|w3] (HP,HP+CP) bf16, [b1|b2|b3] (1,2HP+CP) f32."""
    w1, b1 = params["w1"], params["b1"]
    w2, b2 = params["w2"], params["b2"]
    w3, b3 = params["w3"], params["b3"]

    in_dim, hid = w1.shape
    n_cls = w3.shape[1]
    IP = _round_up(in_dim, 128)
    HP = _round_up(hid, 128)
    CP = _round_up(n_cls, 128)

    def pad2(a, rows, cols, fill=0.0):
        return jnp.pad(a, ((0, rows - a.shape[0]), (0, cols - a.shape[1])),
                       constant_values=fill)

    w1p = pad2(w1, IP, HP).astype(jnp.bfloat16)
    w2p = pad2(w2, HP, HP).astype(jnp.bfloat16)
    w3p = pad2(w3, HP, CP).astype(jnp.bfloat16)
    w23 = jnp.concatenate([w2p, w3p], axis=1)                     # (HP, HP+CP)

    b1p = pad2(b1.astype(jnp.float32), 1, HP, 0.0)
    b2p = pad2(b2.astype(jnp.float32), 1, HP, 0.0)
    b3p = pad2(b3.astype(jnp.float32), 1, CP, _NEG_BIG)
    bias = jnp.concatenate([b1p, b2p, b3p], axis=1)               # (1, 2HP+CP)

    meta = {"in_dim": in_dim, "n_cls": n_cls, "IP": IP, "HP": HP, "CP": CP}
    return (w1p, w23, bias), meta


def predictor_forward(x, packed, meta, *, max_batch_tile=2048):
    """x: (B, input_size) float32 -> (B, num_classes) float32 softmax probs."""
    w1p, w23, bias = packed
    IP, HP, CP = meta["IP"], meta["HP"], meta["CP"]
    B, in_dim = x.shape

    # ---- batch tile selection ------------------------------------------------
    # Multiple of 16 (bf16 packs 16 rows per sublane-vreg), up to max_batch_tile.
    TB = min(_round_up(B, 16), max_batch_tile)

    # Cap TB by the real per-block VMEM footprint (bf16 x + f32 out, both
    # double-buffered, plus the resident weights/bias) so we stay well inside
    # the most conservative default scoped-VMEM budget (16 MiB on v5e) without
    # requesting any vmem_limit_bytes override.
    per_row_bytes = 2 * (IP * 2) + 2 * (CP * 4)
    resident_bytes = 2 * (w1p.size * 2 + w23.size * 2 + 8 * bias.shape[1] * 4)
    rows_fit = max(((12 << 20) - resident_bytes) // per_row_bytes, 16)
    TB = min(TB, max(rows_fit // 16 * 16, 16))

    # v7x has 2 TensorCores: keep >= 2 grid steps whenever the batch allows it
    # so the "parallel" batch axis shards across both (no effect on v5e/v6e).
    if _round_up(B, TB) // TB < 2 and _round_up(B, 16) > 16:
        TB = _round_up(_cdiv(_round_up(B, 16), 2), 16)

    Bp = _round_up(B, TB)

    # Fused pad + cast: x streams HBM->VMEM as bf16 (half the dominant stream),
    # single wrapper-side pass over the activations.
    xp = jnp.pad(x, ((0, Bp - B), (0, IP - in_dim))).astype(jnp.bfloat16)

    flops = 2 * Bp * (IP * HP + HP * HP + HP * CP)
    bytes_accessed = (xp.size * 2 + w1p.size * 2 + w23.size * 2
                      + bias.size * 4 + Bp * CP * 4)
    cost = pl.CostEstimate(flops=flops, transcendentals=Bp * CP,
                           bytes_accessed=bytes_accessed)

    kernel = functools.partial(_predictor_kernel, HP=HP, CP=CP)

    # Note: weight/bias specs could be single-buffered (pipeline_mode=
    # pl.Buffered(1)) to halve their resident VMEM; at HP=CP=128 the saving is
    # negligible so we keep the default for maximum compiler compatibility.
    out = pl.pallas_call(
        kernel,
        # Output stays f32 (module semantics); only n_cls of the CP=128 lanes
        # are real — they are sliced off below.
        out_shape=jax.ShapeDtypeStruct((Bp, CP), jnp.float32),
        grid=(Bp // TB,),
        in_specs=[
            pl.BlockSpec((TB, IP), lambda i: (i, 0)),            # x: batch-tiled, bf16
            pl.BlockSpec((IP, HP), lambda i: (0, 0)),            # w1: resident
            pl.BlockSpec((HP, HP + CP), lambda i: (0, 0)),       # [w2|w3]: resident
            pl.BlockSpec((1, 2 * HP + CP), lambda i: (0, 0)),    # biases: resident
        ],
        out_specs=pl.BlockSpec((TB, CP), lambda i: (i, 0)),      # lane-dense out
        compiler_params=pltpu.CompilerParams(
            dimension_semantics=("parallel",),
        ),
        cost_estimate=cost,
    )(xp, w1p, w23, bias)

    return out[:B, :meta["n_cls"]]


def init_params(key, input_size, hidden_size, num_classes):
    """torch.nn.Linear-style init (uniform +/- 1/sqrt(fan_in)); weights stored
    pre-transposed as (in_features, out_features) so y = x @ W + b."""
    def linear(key, fan_in, fan_out):
        kw, kb = jax.random.split(key)
        bound = 1.0 / jnp.sqrt(fan_in)
        w = jax.random.uniform(kw, (fan_in, fan_out), jnp.float32, -bound, bound)
        b = jax.random.uniform(kb, (1, fan_out), jnp.float32, -bound, bound)
        return w, b

    k1, k2, k3 = jax.random.split(key, 3)
    w1, b1 = linear(k1, input_size, hidden_size)
    w2, b2 = linear(k2, hidden_size, hidden_size)
    w3, b3 = linear(k3, hidden_size, num_classes)
    return {"w1": w1, "b1": b1, "w2": w2, "b2": b2, "w3": w3, "b3": b3}


def reference_forward(x, params):
    h1 = jnp.maximum(x @ params["w1"] + params["b1"], 0.0)
    h2 = jnp.maximum(h1 @ params["w2"] + params["b2"], 0.0)
    logits = h2 @ params["w3"] + params["b3"]
    return jax.nn.softmax(logits, axis=1)


if __name__ == "__main__":
    batch, input_size, hidden_size, num_classes = 4, 16, 32, 10

    key = jax.random.PRNGKey(0)
    kx, kp = jax.random.split(key)
    x = jax.random.normal(kx, (batch, input_size), jnp.float32)
    params = init_params(kp, input_size, hidden_size, num_classes)

    packed, meta = pack_params(params)
    out = predictor_forward(x, packed, meta)
    out = jax.block_until_ready(out)

    # Sanity checks
    assert out.shape == (batch, num_classes)
    assert jnp.allclose(jnp.sum(out, axis=1), 1.0, atol=1e-3)  # exact reciprocal
    ref = reference_forward(x, params)                          # f32 reference
    assert jnp.allclose(out, ref, atol=2e-2)                    # bf16 matmul/x tol

    print("KERNEL_OK")
</pallas_src>

<mosaic_0001>
module attributes {stable_mosaic.version = 11 : i64} {
  func.func @_predictor_kernel(%arg0: i32, %arg1: memref<16x128xbf16, #tpu.memory_space<vmem>>, %arg2: memref<128x128xbf16, #tpu.memory_space<vmem>>, %arg3: memref<128x256xbf16, #tpu.memory_space<vmem>>, %arg4: memref<1x384xf32, #tpu.memory_space<vmem>>, %arg5: memref<16x128xf32, #tpu.memory_space<vmem>>) attributes {dimension_semantics = [#tpu.dimension_semantics<parallel>], iteration_bounds = array<i64: 1>, scalar_prefetch = 0 : i64, scratch_operands = 0 : i64, tpu.core_type = #tpu.core_type<tc>, window_params = [{transform_indices = @transform_0, window_bounds = array<i64: 16, 128>}, {pipeline_mode = #tpu.pipeline_mode<synchronous>, transform_indices = @transform_1, window_bounds = array<i64: 128, 128>}, {pipeline_mode = #tpu.pipeline_mode<synchronous>, transform_indices = @transform_2, window_bounds = array<i64: 128, 256>}, {pipeline_mode = #tpu.pipeline_mode<synchronous>, transform_indices = @transform_3, window_bounds = array<i64: 1, 384>}, {transform_indices = @transform_4, window_bounds = array<i64: 16, 128>}]} {
    %c0 = arith.constant 0 : index
    %c0_0 = arith.constant 0 : index
    %0 = vector.load %arg1[%c0, %c0_0] : memref<16x128xbf16, #tpu.memory_space<vmem>>, vector<16x128xbf16>
    %c0_1 = arith.constant 0 : index
    %c0_2 = arith.constant 0 : index
    %1 = vector.load %arg4[%c0_1, %c0_2] : memref<1x384xf32, #tpu.memory_space<vmem>>, vector<1x128xf32>
    %c0_3 = arith.constant 0 : index
    %c128 = arith.constant 128 : index
    %2 = vector.load %arg4[%c0_3, %c128] : memref<1x384xf32, #tpu.memory_space<vmem>>, vector<1x128xf32>
    %c0_4 = arith.constant 0 : index
    %c256 = arith.constant 256 : index
    %3 = vector.load %arg4[%c0_4, %c256] : memref<1x384xf32, #tpu.memory_space<vmem>>, vector<1x128xf32>
    %c0_5 = arith.constant 0 : index
    %c0_6 = arith.constant 0 : index
    %4 = vector.load %arg2[%c0_5, %c0_6] : memref<128x128xbf16, #tpu.memory_space<vmem>>, vector<128x128xbf16>
    %cst = arith.constant dense<0.000000e+00> : vector<16x128xf32>
    %5 = tpu.matmul %0, %4, %cst {dimension_numbers = #tpu.dot_dimension_numbers<[1], [0], [0], [1], [0, 0, 1, 1], [], []>} : vector<16x128xbf16>, vector<128x128xbf16>, vector<16x128xf32> -> vector<16x128xf32>
    %6 = vector.broadcast %1 : vector<1x128xf32> to vector<16x128xf32>
    %7 = arith.addf %5, %6 : vector<16x128xf32>
    %cst_7 = arith.constant 0.000000e+00 : f32
    %8 = vector.broadcast %cst_7 : f32 to vector<16x128xf32>
    %9 = arith.maximumf %7, %8 : vector<16x128xf32>
    %c0_8 = arith.constant 0 : index
    %c0_9 = arith.constant 0 : index
    %10 = vector.load %arg3[%c0_8, %c0_9] : memref<128x256xbf16, #tpu.memory_space<vmem>>, vector<128x128xbf16>
    %11 = arith.truncf %9 : vector<16x128xf32> to vector<16x128xbf16>
    %cst_10 = arith.constant dense<0.000000e+00> : vector<16x128xf32>
    %12 = tpu.matmul %11, %10, %cst_10 {dimension_numbers = #tpu.dot_dimension_numbers<[1], [0], [0], [1], [0, 0, 1, 1], [], []>} : vector<16x128xbf16>, vector<128x128xbf16>, vector<16x128xf32> -> vector<16x128xf32>
    %13 = vector.broadcast %2 : vector<1x128xf32> to vector<16x128xf32>
    %14 = arith.addf %12, %13 : vector<16x128xf32>
    %cst_11 = arith.constant 0.000000e+00 : f32
    %15 = vector.broadcast %cst_11 : f32 to vector<16x128xf32>
    %16 = arith.maximumf %14, %15 : vector<16x128xf32>
    %c0_12 = arith.constant 0 : index
    %c128_13 = arith.constant 128 : index
    %17 = vector.load %arg3[%c0_12, %c128_13] : memref<128x256xbf16, #tpu.memory_space<vmem>>, vector<128x128xbf16>
    %18 = arith.truncf %16 : vector<16x128xf32> to vector<16x128xbf16>
    %cst_14 = arith.constant dense<0.000000e+00> : vector<16x128xf32>
    %19 = tpu.matmul %18, %17, %cst_14 {dimension_numbers = #tpu.dot_dimension_numbers<[1], [0], [0], [1], [0, 0, 1, 1], [], []>} : vector<16x128xbf16>, vector<128x128xbf16>, vector<16x128xf32> -> vector<16x128xf32>
    %20 = vector.broadcast %3 : vector<1x128xf32> to vector<16x128xf32>
    %21 = arith.addf %19, %20 : vector<16x128xf32>
    %cst_15 = arith.constant dense<0xFF800000> : vector<16xf32>
    %22 = vector.multi_reduction <maximumf>, %21, %cst_15 [1] : vector<16x128xf32> to vector<16xf32>
    %23 = vector.shape_cast %22 : vector<16xf32> to vector<16x1xf32>
    %24 = vector.broadcast %23 : vector<16x1xf32> to vector<16x128xf32>
    %25 = arith.subf %21, %24 : vector<16x128xf32>
    %26 = math.exp %25 : vector<16x128xf32>
    %cst_16 = arith.constant dense<0.000000e+00> : vector<16xf32>
    %27 = vector.multi_reduction <add>, %26, %cst_16 [1] : vector<16x128xf32> to vector<16xf32>
    %28 = vector.shape_cast %27 : vector<16xf32> to vector<16x1xf32>
    %29 = tpu.reciprocal %28 : vector<16x1xf32> -> vector<16x1xf32>
    %30 = vector.broadcast %29 : vector<16x1xf32> to vector<16x128xf32>
    %31 = arith.mulf %26, %30 : vector<16x128xf32>
    %c0_17 = arith.constant 0 : index
    %c0_18 = arith.constant 0 : index
    %32 = vector.load %arg5[%c0_17, %c0_18] : memref<16x128xf32, #tpu.memory_space<vmem>>, vector<16x128xf32>
    tpu.vector_store %arg5[%c0_17, %c0_18], %31 {strides = array<i32>} : memref<16x128xf32, #tpu.memory_space<vmem>>, vector<16x128xf32>,
    return
  }
  func.func @transform_0(%arg0: i32) -> (i32, i32) {
    %c0_i32 = arith.constant 0 : i32
    %c0_i32_0 = arith.constant 0 : i32
    return %arg0, %c0_i32 : i32, i32
  }
  func.func @transform_1(%arg0: i32) -> (i32, i32) {
    %c0_i32 = arith.constant 0 : i32
    %c0_i32_0 = arith.constant 0 : i32
    %c0_i32_1 = arith.constant 0 : i32
    return %c0_i32, %c0_i32_0 : i32, i32
  }
  func.func @transform_2(%arg0: i32) -> (i32, i32) {
    %c0_i32 = arith.constant 0 : i32
    %c0_i32_0 = arith.constant 0 : i32
    %c0_i32_1 = arith.constant 0 : i32
    return %c0_i32, %c0_i32_0 : i32, i32
  }
  func.func @transform_3(%arg0: i32) -> (i32, i32) {
    %c0_i32 = arith.constant 0 : i32
    %c0_i32_0 = arith.constant 0 : i32
    %c0_i32_1 = arith.constant 0 : i32
    return %c0_i32, %c0_i32_0 : i32, i32
  }
  func.func @transform_4(%arg0: i32) -> (i32, i32) {
    %c0_i32 = arith.constant 0 : i32
    %c0_i32_0 = arith.constant 0 : i32
    return %arg0, %c0_i32 : i32, i32
  }
}

</mosaic_0001>

<bundles_post_ra>
// kernel: tpu_custom_call.1
= control target key start
LH: loop header
LB: loop body
LE: loop exit
PB: predicated region body
PF: predicated region fallthrough
CT: control target
= control target key end

     0   :  { %9 = vsyncpa [#allocation3], 0  ;;  %s734_s0 = inlined_call_operand.hbm [shape: bf16[16,128], index: 0, kind: input, shape index: {}]   ;;  %s735_s1 = inlined_call_operand.hbm [shape: bf16[128,128], index: 1, kind: input, shape index: {}]   ;;  %s736_s2 = inlined_call_operand.hbm [shape: bf16[128,256], index: 2, kind: input, shape index: {}]   ;;  %s737_s3 = inlined_call_operand.hbm [shape: f32[1,384], index: 3, kind: input, shape index: {}]   ;;  %s738_s4 = inlined_call_operand.hbm [shape: f32[16,128], index: 4, kind: output, shape index: {}]  }
   0x1   :  { %10 = vsyncpa [#allocation6], 0 }
   0x2   :  { %11 = vsyncpa [#allocation9], 0 }
   0x3   :  { %12 = vsyncpa [#allocation4], 0  ;;  %s30_s17 = sshll.u32 %s735_s1, 4  ;;  %s679_s18 = smov [#allocation5]   ;;  %s31_s17 = int_to_ptr.hbm [resolvable:$true] %s30_s17 }
   0x4   :  { %s32_s19 = sshll.u32 %s679_s18, 4  ;;  %s17_s22 = sshll.u32 %s734_s0, 4  ;;  %s33_s19 = int_to_ptr.vmem [resolvable:$true] %s32_s19  ;;  %s18_s22 = int_to_ptr.hbm [resolvable:$true] %s17_s22 }
   0x5   :  { %s680_s23 = smov 64   ;;  %s681_s24 = smov 4  }
   0x6   :  { %38 = dma.hbm_to_vmem [thread:$0]  %s31_s17, 1024, %s33_s19, [#allocation6], %s680_s23, %s680_s23, %s681_s24  }
   0x7   :  { %s682_s25 = smov [#allocation2]   ;;  %s43_s29 = sshll.u32 %s736_s2, 4  ;;  %s44_s29 = int_to_ptr.hbm [resolvable:$true] %s43_s29 }
   0x8   :  { %s19_s26 = sshll.u32 %s682_s25, 4  ;;  %s683_s1 = smov [#allocation7]   ;;  %s20_s26 = int_to_ptr.vmem [resolvable:$true] %s19_s26 }
   0x9   :  { %25 = dma.hbm_to_vmem [thread:$0]  %s18_s22, 128, %s20_s26, [#allocation3], %s680_s23, %s680_s23, %s681_s24  }
   0xa   :  { %s45_s30 = sshll.u32 %s683_s1, 4  ;;  %s57_s0 = sshll.u32 %s737_s3, 4  ;;  %s46_s30 = int_to_ptr.vmem [resolvable:$true] %s45_s30  ;;  %s58_s0 = int_to_ptr.hbm [resolvable:$true] %s57_s0 }
   0xb   :  { %s684_s7 = smov 128   ;;  %s685_s8 = smov 8  }
   0xc   :  { %51 = dma.hbm_to_vmem [thread:$0]  %s44_s29, 2048, %s46_s30, [#allocation6], %s684_s7, %s684_s7, %s685_s8  }
   0xd   :  { %s686_s9 = smov [#allocation8]  }
   0xe   :  { %s59_s10 = sshll.u32 %s686_s9, 4  ;;  %s60_s10 = int_to_ptr.vmem [resolvable:$true] %s59_s10 }
   0xf   :  { %62 = dma.hbm_to_vmem [thread:$0]  %s58_s0, 48, %s60_s10, [#allocation9]  }
  0x10   :  { %671 = dma.done.wait [#allocation3], 128  }
  0x11   :  { %672 = vsyncadd [#allocation3], 4294967168 }
  0x12   :  { %673 = dma.done.wait [#allocation6], 3072  }
  0x13   :  { %674 = vsyncadd [#allocation6], 4294964224 }
  0x14   :  { %675 = dma.done.wait [#allocation9], 48  }
  0x15   :  { %676 = vsyncadd [#allocation9], 4294967248  ;;  %v514_v0 = vld [vmem:[#allocation5 + $0x38] sm:$0xff]  ;;  %v513_v1 = vld [vmem:[#allocation5 + $0x30] sm:$0xff]  ;;  %s687_s2 = smov [#allocation10]   ;;  %s391_s13 = sshll.u32 %s738_s4, 4  ;;  %s392_s13 = int_to_ptr.hbm [resolvable:$true] %s391_s13 }
  0x16   :  { %157 = vmatpush.bf16.msra.mxu0 %v514_v0  ;;  %v472_v2 = vld [vmem:[#allocation7 + $0x70] sm:$0xf]  ;;  %v522_v3 = vld [vmem:[#allocation7 + $0x74] sm:$0xf0]  ;;  %v468_v4 = vld [vmem:[#allocation7 + $0x60] sm:$0xf] }
  0x17   :  { %v473_v5 = vor.u32 %v522_v3, %v472_v2  ;;  %v521_v6 = vld [vmem:[#allocation7 + $0x64] sm:$0xf0]  ;;  %v464_v9 = vld [vmem:[#allocation7 + $0x50] sm:$0xf]  ;;  %v520_v10 = vld [vmem:[#allocation7 + $0x54] sm:$0xf0] }
  0x18   :  { %v512_v7 = vld [vmem:[#allocation5 + $0x28] sm:$0xff]  ;;  %v469_v8 = vor.u32 %v521_v6, %v468_v4  ;;  %v511_v11 = vld [vmem:[#allocation5 + $0x20] sm:$0xff]  ;;  %v465_v12 = vor.u32 %v520_v10, %v464_v9  ;;  %v510_v15 = vld [vmem:[#allocation5 + $0x18] sm:$0xff]  ;;  %s389_s3 = sshll.u32 %s687_s2, 4  ;;  %s390_s3 = int_to_ptr.vmem [resolvable:$true] %s389_s3 }
  0x19   :  { %241 = vmatpush.bf16.msra.mxu1 %v473_v5  ;;  %v460_v13 = vld [vmem:[#allocation7 + $0x40] sm:$0xf]  ;;  %v519_v14 = vld [vmem:[#allocation7 + $0x44] sm:$0xf0]  ;;  %v509_v17 = vld [vmem:[#allocation5 + $0x10] sm:$0xff] }
  0x1a   :  { %158 = vmatpush.bf16.msra.mxu0 %v513_v1  ;;  %v461_v16 = vor.u32 %v519_v14, %v460_v13  ;;  %v508_v18 = vld [vmem:[#allocation5 + $0x8] sm:$0xff]  ;;  %v507_v19 = vld [vmem:[#allocation5] sm:$0xff]  ;;  %v506_v20 = vld [vmem:[#allocation2] sm:$0xff] }
  0x1b   :  { %v456_v21 = vld [vmem:[#allocation7 + $0x30] sm:$0xf]  ;;  %v518_v22 = vld [vmem:[#allocation7 + $0x34] sm:$0xf0]  ;;  %v452_v24 = vld [vmem:[#allocation7 + $0x20] sm:$0xf] }
  0x1c   :  { %v457_v23 = vor.u32 %v518_v22, %v456_v21  ;;  %v517_v25 = vld [vmem:[#allocation7 + $0x24] sm:$0xf0]  ;;  %v448_v27 = vld [vmem:[#allocation7 + $0x10] sm:$0xf]  ;;  %v516_v28 = vld [vmem:[#allocation7 + $0x14] sm:$0xf0] }
  0x1d   :  { %242 = vmatpush.bf16.msra.mxu1 %v469_v8  ;;  %v453_v26 = vor.u32 %v517_v25, %v452_v24  ;;  %v449_v29 = vor.u32 %v516_v28, %v448_v27  ;;  %v444_v30 = vld [vmem:[#allocation7] sm:$0xf]  ;;  %v515_v31 = vld [vmem:[#allocation7 + $0x4] sm:$0xf0]  ;;  %v504_v33 = vld [vmem:[#allocation7 + $0x74] sm:$0xf] }
  0x1e   :  { %159 = vmatpush.bf16.msra.mxu0 %v512_v7  ;;  %v445_v32 = vor.u32 %v515_v31, %v444_v30  ;;  %v530_v34 = vld [vmem:[#allocation7 + $0x78] sm:$0xf0]  ;;  %v500_v35 = vld [vmem:[#allocation7 + $0x64] sm:$0xf]  ;;  %v529_v37 = vld [vmem:[#allocation7 + $0x68] sm:$0xf0] }
  0x1f   :  { %v505_v36 = vor.u32 %v530_v34, %v504_v33  ;;  %v501_v38 = vor.u32 %v529_v37, %v500_v35  ;;  %v496_v39 = vld [vmem:[#allocation7 + $0x54] sm:$0xf]  ;;  %v528_v40 = vld [vmem:[#allocation7 + $0x58] sm:$0xf0]  ;;  %v492_v42 = vld [vmem:[#allocation7 + $0x44] sm:$0xf] }
  0x20   :  { %v497_v41 = vor.u32 %v528_v40, %v496_v39  ;;  %v527_v43 = vld [vmem:[#allocation7 + $0x48] sm:$0xf0]  ;;  %v540_v46 = vld [vmem:[#allocation8] ss:$0 sm:$0xff]  ;;  %v488_v53 = vld [vmem:[#allocation7 + $0x34] sm:$0xf] }
  0x21   :  { %243 = vmatpush.bf16.msra.mxu1 %v465_v12  ;;  %325 = vmatpush.bf16.msra.mxu2 %v505_v36  ;;  %v493_v44 = vor.u32 %v527_v43, %v492_v42  ;;  %v526_v54 = vld [vmem:[#allocation7 + $0x38] sm:$0xf0]  ;;  %v484_v56 = vld [vmem:[#allocation7 + $0x24] sm:$0xf]  ;;  %v525_v57 = vld [vmem:[#allocation7 + $0x28] sm:$0xf0] }
  0x22   :  { %160 = vmatpush.bf16.msra.mxu0 %v511_v11  ;;  %v489_v55 = vor.u32 %v526_v54, %v488_v53  ;;  %v485_v58 = vor.u32 %v525_v57, %v484_v56  ;;  %v480_v59 = vld [vmem:[#allocation7 + $0x14] sm:$0xf]  ;;  %v524_v60 = vld [vmem:[#allocation7 + $0x18] sm:$0xf0]  ;;  %v476_v62 = vld [vmem:[#allocation7 + $0x4] sm:$0xf] }
  0x23   :  { %v481_v61 = vor.u32 %v524_v60, %v480_v59  ;;  %v523_v63 = vld [vmem:[#allocation7 + $0x8] sm:$0xf0]  ;;  %v541_v2 = vld [vmem:[#allocation8 + $0x1] ss:$0 sm:$0xff]  ;;  %v542_v9 = vld [vmem:[#allocation8 + $0x2] ss:$0 sm:$0xff] }
  0x24   :  { %v477_v0 = vor.u32 %v523_v63, %v476_v62 }
  0x25   :  { %244 = vmatpush.bf16.msra.mxu1 %v461_v16  ;;  %326 = vmatpush.bf16.msra.mxu2 %v501_v38 }
  0x26   :  { %161 = vmatpush.bf16.msra.mxu0 %v510_v15 }
  0x29   :  { %245 = vmatpush.bf16.msra.mxu1 %v457_v23  ;;  %327 = vmatpush.bf16.msra.mxu2 %v497_v41 }
  0x2a   :  { %162 = vmatpush.bf16.msra.mxu0 %v509_v17 }
  0x2d   :  { %246 = vmatpush.bf16.msra.mxu1 %v453_v26  ;;  %328 = vmatpush.bf16.msra.mxu2 %v493_v44 }
  0x2e   :  { %163 = vmatpush.bf16.msra.mxu0 %v508_v18 }
  0x31   :  { %247 = vmatpush.bf16.msra.mxu1 %v449_v29  ;;  %329 = vmatpush.bf16.msra.mxu2 %v489_v55 }
  0x32   :  { %164 = vmatpush.bf16.msra.mxu0 %v507_v19 }
  0x35   :  { %165 = vmatmul.bf16.vlgmr.msra.gmra.mxu0 %v506_v20  ;;  %248 = vmatpush.bf16.msra.mxu1 %v445_v32 }
  0x36   :  { %330 = vmatpush.bf16.msra.mxu2 %v485_v58 }
  0x3a   :  { %331 = vmatpush.bf16.msra.mxu2 %v481_v61 }
  0x3e   :  { %332 = vmatpush.bf16.msra.mxu2 %v477_v0 }
  0xb2   :  { %v166_v45 = vpop.f32.mrf.mxu0 }
  0xb3   :  { %v167_v47 = vadd.f32 %v540_v46, %v166_v45 }
  0xb5   :  { %v171_v50 = vmax.f32 %v167_v47, 0.0 }
  0xba   :  { %v168_v48 = vpop.f32.mrf.mxu0 }
  0xbb   :  { %v169_v49 = vadd.f32 %v540_v46, %v168_v48 }
  0xbd   :  { %v172_v51 = vmax.f32 %v169_v49, 0.0 }
  0xbf   :  { %v189_v52 = vpack.c.bf16 %v172_v51, %v171_v50 }
  0xc1   :  { %249 = vmatmul.bf16.vlgmr.msra.gmra.mxu1 %v189_v52 }
 0x13e   :  { %v250_v1 = vpop.f32.mrf.mxu1 }
 0x13f   :  { %v251_v3 = vadd.f32 %v541_v2, %v250_v1 }
 0x141   :  { %v255_v6 = vmax.f32 %v251_v3, 0.0 }
 0x146   :  { %v252_v4 = vpop.f32.mrf.mxu1 }
 0x147   :  { %v253_v5 = vadd.f32 %v541_v2, %v252_v4 }
 0x149   :  { %v256_v7 = vmax.f32 %v253_v5, 0.0 }
 0x14b   :  { %v273_v8 = vpack.c.bf16 %v256_v7, %v255_v6 }
 0x14d   :  { %333 = vmatmul.bf16.vlgmr.msra.gmra.mxu2 %v273_v8 }
 0x1d0   :  { %v334_v10 = vpop.f32.mrf.mxu2 }
 0x1d1   :  { %v335_v11 = vadd.f32 %v542_v9, %v334_v10 }
 0x1d3   :  { %339 = vmax.xlane.f32.xlu0 %v335_v11 }
 0x1d8   :  { %v336_v12 = vpop.f32.mrf.mxu2 }
 0x1d9   :  { %v337_v13 = vadd.f32 %v542_v9, %v336_v12 }
 0x1db   :  { %341 = vmax.xlane.f32.xlu0 %v337_v13 }
 0x246   :  { %v340_v14 = vpop.xlane.xlu0 %339 }
 0x247   :  { %v343_v15 = vsub.f32 %v335_v11, %v340_v14 }
 0x249   :  { %v345_v16 = vmul.f32 1.442695, %v343_v15 }
 0x24b   :  { %543 = vpow2.f32 %v345_v16 }
 0x24e   :  { %v342_v17 = vpop.xlane.xlu0 %341 }
 0x24f   :  { %v344_v18 = vsub.f32 %v337_v13, %v342_v17 }
 0x251   :  { %v544_v19 = vpop.eup %543  ;;  %v347_v20 = vmul.f32 1.442695, %v344_v18 }
 0x252   :  { %349 = vadd.xlane.f32.xlu1 %v544_v19 }
 0x253   :  { %545 = vpow2.f32 %v347_v20 }
 0x259   :  { %v546_v21 = vpop.eup %545 }
 0x25a   :  { %351 = vadd.xlane.f32.xlu1 %v546_v21 }
 0x2c5   :  { %v350_v22 = vpop.xlane.xlu1 %349 }
 0x2c6   :  { %547 = vrcp.f32 %v350_v22  ;;  %v364_v27 = vand.u32 2147483648, %v350_v22  ;;  %v362_v29 = vand.u32 2147483647, %v350_v22  ;;  %vm358_vm1 = vweird.f32 %v350_v22 }
 0x2c8   :  { %v365_v32 = vor.u32 1.1754944e-38, %v364_v27  ;;  %vm363_vm3 = vcmp.eq.f32.partialorder %v362_v29, 8.507059e+37 }
 0x2cc   :  { %v548_v23 = vpop.eup %547 }
 0x2cd   :  { %v354_v24 = vmul.f32 %v548_v23, %v350_v22  ;;  %v352_v25 = vpop.xlane.xlu1 %351  ;;  %vm359_vm0 = vweird.f32 %v548_v23 }
 0x2ce   :  { %549 = vrcp.f32 %v352_v25  ;;  %vm360_vm2 = vmor %vm358_vm1, %vm359_vm0  ;;  %v378_v38 = vand.u32 2147483648, %v352_v25  ;;  %v376_v40 = vand.u32 2147483647, %v352_v25  ;;  %vm372_vm5 = vweird.f32 %v352_v25 }
 0x2cf   :  { %v355_v26 = vsub.f32 1.0, %v354_v24 }
 0x2d0   :  { %v379_v42 = vor.u32 1.1754944e-38, %v378_v38  ;;  %vm377_vm7 = vcmp.eq.f32.partialorder %v376_v40, 8.507059e+37 }
 0x2d1   :  { %v356_v28 = vmul.f32 %v548_v23, %v355_v26 }
 0x2d3   :  { %v357_v30 = vadd.f32 %v548_v23, %v356_v28 }
 0x2d4   :  { %v550_v31 = vpop.eup %549 }
 0x2d5   :  { %v368_v33 = vmul.f32 %v550_v31, %v352_v25  ;;  %v361_v34 = vsel %vm360_vm2, %v548_v23, %v357_v30  ;;  %vm373_vm4 = vweird.f32 %v550_v31 }
 0x2d6   :  { %v366_v35 = vsel %vm363_vm3, %v365_v32, %v361_v34  ;;  %vm374_vm6 = vmor %vm372_vm5, %vm373_vm4 }
 0x2d7   :  { %v369_v36 = vsub.f32 1.0, %v368_v33  ;;  %v381_v37 = vmul.f32 %v544_v19, %v366_v35 }
 0x2d9   :  { %v370_v39 = vmul.f32 %v550_v31, %v369_v36  ;;  %383 = vst [vmem:[#allocation10] sm:$0xff] %v381_v37 }
 0x2db   :  { %v371_v41 = vadd.f32 %v550_v31, %v370_v39 }
 0x2dd   :  { %v375_v43 = vsel %vm374_vm6, %v550_v31, %v371_v41 }
 0x2de   :  { %v380_v44 = vsel %vm377_vm7, %v379_v42, %v375_v43 }
 0x2df   :  { %v382_v45 = vmul.f32 %v546_v21, %v380_v44 }
 0x2e1   :  { %384 = vst [vmem:[#allocation10 + $0x8] sm:$0xff] %v382_v45 }
 0x2e2   :  { %397 = dma.vmem_to_hbm [thread:$0]  %s390_s3, 256, %s392_s13, [#allocation4], %s684_s7, %s684_s7, %s685_s8  }
 0x2e3   :  { %677 = dma.done.wait [#allocation4], 256  }
 0x2e4   :  { %678 = vsyncadd [#allocation4], 4294967040 }
 0x2e5   :  { %402 = vsyncpa [#allocation3], 1 }
 0x2e6   :  { %403 = vsyncpa [#allocation6], 1 }
 0x2e7   :  { %404 = vsyncpa [#allocation9], 1 }
 0x2e8   :  { %405 = vsyncpa [#allocation4], 1 }

</bundles_post_ra>
